<compile_context>
chip_gen: v6e
topology: v6e:2x2x1
jax: 0.10.0
libtpu: 0.0.40
codegen_flags: <defaults>
</compile_context>

<pallas_src>
import functools

import jax
import jax.numpy as jnp
from jax.experimental import pallas as pl
from jax.experimental.pallas import tpu as pltpu


def _attention_kernel(hidden_ref, enc_ref, wht_ref, wet_ref, bias_ref, v_ref,
                      out_ref, hproj_ref, *, seq_len):
    """Grid = (batch tiles, seq tiles); the seq axis is the sequential axis."""
    s = pl.program_id(1)
    num_s = pl.num_programs(1)
    tb, ts, hdim = enc_ref.shape

    # Hidden projection + bias, once per batch tile (re-used across seq tiles).
    @pl.when(s == 0)
    def _():
        hproj_ref[...] = (
            jnp.dot(hidden_ref[...], wht_ref[...],
                    preferred_element_type=jnp.float32)
            + bias_ref[...].astype(jnp.float32))

    enc = enc_ref[...]                                   # (tb, ts, H) bf16

    # Encoder projection on the MXU.  Use a single flattened (tb*ts, H) matmul
    # only when the flatten is a layout no-op; otherwise per-row matmuls.
    sublane_pack = 8 * (4 // enc.dtype.itemsize)         # 8 for f32, 16 for bf16
    if tb == 1 or ts % sublane_pack == 0:
        e_proj = jnp.dot(enc.reshape(tb * ts, hdim), wet_ref[...],
                         preferred_element_type=jnp.float32).reshape(tb, ts, hdim)
    else:
        e_proj = jnp.concatenate(
            [jnp.dot(enc[i], wet_ref[...],
                     preferred_element_type=jnp.float32)[None]
             for i in range(tb)], axis=0)

    # energy = tanh(attn([hidden; enc]))   (all f32 on the VPU/EUP)
    energy = jnp.tanh(e_proj + hproj_ref[...][:, None, :])        # (tb, ts, H)

    # score = v(energy).squeeze(-1): VPU multiply + lane reduce (no N=1 matmul).
    v_row = v_ref[...].astype(jnp.float32)                        # (1, H)
    score = jnp.sum(energy * v_row[None, :, :], axis=-1)          # (tb, ts) f32

    # Mask seq padding of the ragged last tile so it cannot touch the softmax.
    col = s * ts + jax.lax.broadcasted_iota(jnp.int32, (tb, ts), 1)
    score = jnp.where(col < seq_len, score, -jnp.inf)

    # Park raw scores in the resident output block (doubles as the score buffer).
    out_ref[:, s, :] = score

    # Exact, numerically stable softmax over the whole sequence on the last step.
    @pl.when(s == num_s - 1)
    def _():
        sc = out_ref[...]                                          # (tb, n_s, ts)
        m = jnp.max(jnp.max(sc, axis=2, keepdims=True), axis=1, keepdims=True)
        ex = jnp.exp(sc - m)
        denom = jnp.sum(jnp.sum(ex, axis=2, keepdims=True), axis=1, keepdims=True)
        out_ref[...] = (ex / denom).astype(out_ref.dtype)


def _vmem_step_bytes(tb, ts, n_s, hdim, p_bytes):
    """Honest per-grid-step VMEM footprint (all live buffers, not just one temp)."""
    s_pad = n_s * ts
    return (2 * tb * ts * hdim * p_bytes      # enc tile, double-buffered
            + 2 * tb * hdim * p_bytes         # hidden tile, double-buffered
            + 2 * 2 * hdim * hdim * p_bytes   # wh_t + we_t (resident, 2 bufs each)
            + 2 * 2 * hdim * 4                # bias + v
            + 2 * tb * s_pad * 4              # resident f32 score/output block
            + tb * hdim * 4                   # h_proj scratch
            + 3 * tb * ts * hdim * 4          # e_proj / energy / energy*v f32 temps
            + 3 * tb * s_pad * 4)             # softmax temporaries at finalize


def attention_forward(hidden, encoder_outputs, attn_weight, attn_bias, v_weight,
                      *, param_dtype=jnp.bfloat16, batch_tile=None, seq_tile=None,
                      vmem_budget_bytes=28 * 1024 * 1024):
    """Pallas equivalent of Attention.forward.

    hidden:          (B, H)
    encoder_outputs: (B, S, H)
    attn_weight:     (H, 2H)   -- torch nn.Linear(hidden*2, hidden).weight
    attn_bias:       (H,)
    v_weight:        (1, H)    -- torch nn.Linear(hidden, 1, bias=False).weight
    returns:         (B, S) float32 softmax attention weights over seq.
    """
    # Edge case carried over verbatim from the PyTorch module.
    if hidden.shape[0] == 1 and encoder_outputs.shape[0] != 1:
        encoder_outputs = encoder_outputs[:1, :, :]

    B, H = hidden.shape
    _, S, _ = encoder_outputs.shape
    p_bytes = jnp.dtype(param_dtype).itemsize

    # Wrapper-side layout plumbing: split the concat-Linear, pre-transpose both
    # halves to MXU (M,K)x(K,N) orientation, cast HBM-heavy operands to bf16.
    wh_t = attn_weight[:, :H].T.astype(param_dtype)       # (H, H) hidden half
    we_t = attn_weight[:, H:].T.astype(param_dtype)       # (H, H) encoder half
    bias2d = attn_bias.reshape(1, H).astype(jnp.float32)
    v_row = v_weight.reshape(1, H).astype(jnp.float32)
    hidden_c = hidden.astype(param_dtype)
    enc_c = encoder_outputs.astype(param_dtype)

    # ---- tile selection driven by the SUM of per-step VMEM buffers ------------
    tb = batch_tile if batch_tile is not None else (B if B <= 8 else 8)
    assert tb == B or tb % 8 == 0, "batch_tile must equal B or be a multiple of 8"

    if seq_tile is None:
        per_ts = tb * (H * (2 * p_bytes + 12) + 5 * 4)    # bytes proportional to ts
        fixed = (2 * 2 * H * H * p_bytes + 2 * 2 * H * 4  # resident weights/bias/v
                 + 2 * tb * H * p_bytes + tb * H * 4      # hidden tile + h_proj
                 + 5 * tb * S * 4)                        # scores + softmax temps
        ts = max((vmem_budget_bytes - fixed) // per_ts, 16)
        ts = max((ts // 16) * 16, 16)                     # keep MXU flatten a no-op
        if ts >= S:
            ts = S
    else:
        ts = seq_tile
    assert ts == S or ts % 8 == 0, "seq_tile must equal S or be a multiple of 8"

    n_b = pl.cdiv(B, tb)
    n_s = pl.cdiv(S, ts)

    est = _vmem_step_bytes(tb, ts, n_s, H, p_bytes)
    # Explicit limit: never rely on the default scoped-VMEM limit (16 MiB on v5e,
    # 32 MiB on v6e/v7x); stay below v7x's 64 MiB physical VMEM.
    vmem_limit = int(min(max(est * 5 // 4, 32 * 1024 * 1024), 64 * 1024 * 1024))

    kernel = functools.partial(_attention_kernel, seq_len=S)

    grid_spec = pltpu.PrefetchScalarGridSpec(
        num_scalar_prefetch=0,
        grid=(n_b, n_s),
        in_specs=[
            pl.BlockSpec((tb, H), lambda b, s: (b, 0)),          # hidden tile
            pl.BlockSpec((tb, ts, H), lambda b, s: (b, s, 0)),   # enc tile (streamed)
            pl.BlockSpec((H, H), lambda b, s: (0, 0)),           # wh_t (resident)
            pl.BlockSpec((H, H), lambda b, s: (0, 0)),           # we_t (resident)
            pl.BlockSpec((1, H), lambda b, s: (0, 0)),           # bias (resident)
            pl.BlockSpec((1, H), lambda b, s: (0, 0)),           # v    (resident)
        ],
        # Scores/weights stay resident across the seq axis (accumulator pattern).
        out_specs=pl.BlockSpec((tb, n_s, ts), lambda b, s: (b, 0, 0)),
        scratch_shapes=[pltpu.VMEM((tb, H), jnp.float32)],       # h_proj + bias
    )

    out3 = pl.pallas_call(
        kernel,
        out_shape=jax.ShapeDtypeStruct((B, n_s, ts), jnp.float32),
        grid_spec=grid_spec,
        compiler_params=pltpu.CompilerParams(
            dimension_semantics=("parallel", "arbitrary"),
            vmem_limit_bytes=vmem_limit,
        ),
    )(hidden_c, enc_c, wh_t, we_t, bias2d, v_row)

    # Drop seq padding: pure layout (free reshape + cheap slice), no compute here.
    return out3.reshape(B, n_s * ts)[:, :S]


if __name__ == "__main__":
    def make_params(keys, H):
        k1, k2, k3 = keys
        bound_attn = 1.0 / jnp.sqrt(2.0 * H)
        attn_weight = jax.random.uniform(k1, (H, 2 * H), jnp.float32,
                                         minval=-bound_attn, maxval=bound_attn)
        attn_bias = jax.random.uniform(k2, (H,), jnp.float32,
                                       minval=-bound_attn, maxval=bound_attn)
        bound_v = 1.0 / jnp.sqrt(float(H))
        v_weight = jax.random.uniform(k3, (1, H), jnp.float32,
                                      minval=-bound_v, maxval=bound_v)
        return attn_weight, attn_bias, v_weight

    def reference(hidden, enc, attn_weight, attn_bias, v_weight, *, cast_bf16):
        if cast_bf16:  # mimic the kernel's bf16 operand rounding
            rd = lambda a: a.astype(jnp.bfloat16).astype(jnp.float32)
            hidden, enc, attn_weight = rd(hidden), rd(enc), rd(attn_weight)
        S = enc.shape[1]
        hid_rep = jnp.repeat(hidden[:, None, :], S, axis=1)
        cat = jnp.concatenate([hid_rep, enc], axis=2)
        energy = jnp.tanh(
            jnp.einsum('bsf,kf->bsk', cat, attn_weight,
                       precision=jax.lax.Precision.HIGHEST) + attn_bias)
        score = jnp.einsum('bsk,ok->bso', energy, v_weight,
                           precision=jax.lax.Precision.HIGHEST)[..., 0]
        return jax.nn.softmax(score, axis=1)

    # --- case 1: module-default small shapes (single seq tile) -----------------
    B, S, H = 2, 8, 32
    k1, k2, k3, k4, k5 = jax.random.split(jax.random.PRNGKey(0), 5)
    attn_weight, attn_bias, v_weight = make_params((k1, k2, k3), H)
    hidden = jax.random.normal(k4, (B, H), jnp.float32)
    enc = jax.random.normal(k5, (B, S, H), jnp.float32)

    out = attention_forward(hidden, enc, attn_weight, attn_bias, v_weight)
    out = jax.block_until_ready(out)

    ref_bf = reference(hidden, enc, attn_weight, attn_bias, v_weight, cast_bf16=True)
    ref_f32 = reference(hidden, enc, attn_weight, attn_bias, v_weight, cast_bf16=False)
    assert out.shape == (B, S)
    assert jnp.allclose(jnp.sum(out, axis=1), 1.0, atol=1e-5)
    assert jnp.allclose(out, ref_bf, atol=2e-3, rtol=2e-3)
    assert jnp.allclose(out, ref_f32, atol=3e-2, rtol=3e-2)

    # --- case 2: exercise the seq-tiled (ragged last tile) grid path -----------
    B2, S2, H2 = 2, 40, 128
    k1, k2, k3, k4, k5 = jax.random.split(jax.random.PRNGKey(1), 5)
    attn_weight2, attn_bias2, v_weight2 = make_params((k1, k2, k3), H2)
    hidden2 = jax.random.normal(k4, (B2, H2), jnp.float32)
    enc2 = jax.random.normal(k5, (B2, S2, H2), jnp.float32)

    out2 = attention_forward(hidden2, enc2, attn_weight2, attn_bias2, v_weight2,
                             seq_tile=16)
    out2 = jax.block_until_ready(out2)
    ref2 = reference(hidden2, enc2, attn_weight2, attn_bias2, v_weight2,
                     cast_bf16=True)
    assert out2.shape == (B2, S2)
    assert jnp.allclose(jnp.sum(out2, axis=1), 1.0, atol=1e-5)
    assert jnp.allclose(out2, ref2, atol=2e-3, rtol=2e-3)

    print("KERNEL_OK")
</pallas_src>

<mosaic_0001>
module attributes {stable_mosaic.version = 11 : i64} {
  func.func @_attention_kernel(%arg0: i32, %arg1: i32, %arg2: memref<2x32xbf16, #tpu.memory_space<vmem>>, %arg3: memref<2x8x32xbf16, #tpu.memory_space<vmem>>, %arg4: memref<32x32xbf16, #tpu.memory_space<vmem>>, %arg5: memref<32x32xbf16, #tpu.memory_space<vmem>>, %arg6: memref<1x32xf32, #tpu.memory_space<vmem>>, %arg7: memref<1x32xf32, #tpu.memory_space<vmem>>, %arg8: memref<2x1x8xf32, #tpu.memory_space<vmem>>, %arg9: memref<2x32xf32, #tpu.memory_space<vmem>>) attributes {dimension_semantics = [#tpu.dimension_semantics<parallel>, #tpu.dimension_semantics<arbitrary>], iteration_bounds = array<i64: 1, 1>, scalar_prefetch = 0 : i64, scratch_operands = 1 : i64, tpu.core_type = #tpu.core_type<tc>, window_params = [{transform_indices = @transform_0, window_bounds = array<i64: 2, 32>}, {transform_indices = @transform_1, window_bounds = array<i64: 2, 8, 32>}, {pipeline_mode = #tpu.pipeline_mode<synchronous>, transform_indices = @transform_2, window_bounds = array<i64: 32, 32>}, {pipeline_mode = #tpu.pipeline_mode<synchronous>, transform_indices = @transform_3, window_bounds = array<i64: 32, 32>}, {pipeline_mode = #tpu.pipeline_mode<synchronous>, transform_indices = @transform_4, window_bounds = array<i64: 1, 32>}, {pipeline_mode = #tpu.pipeline_mode<synchronous>, transform_indices = @transform_5, window_bounds = array<i64: 1, 32>}, {transform_indices = @transform_6, window_bounds = array<i64: 2, 1, 8>}]} {
    %c0_i32 = arith.constant 0 : i32
    %0 = arith.cmpi eq, %arg1, %c0_i32 : i32
    %1 = arith.extui %0 : i1 to i32
    %c0_i32_0 = arith.constant 0 : i32
    %2 = arith.cmpi ne, %1, %c0_i32_0 : i32
    scf.if %2 {
      %c0_19 = arith.constant 0 : index
      %c0_20 = arith.constant 0 : index
      %40 = vector.load %arg2[%c0_19, %c0_20] : memref<2x32xbf16, #tpu.memory_space<vmem>>, vector<2x32xbf16>
      %c0_21 = arith.constant 0 : index
      %c0_22 = arith.constant 0 : index
      %41 = vector.load %arg4[%c0_21, %c0_22] : memref<32x32xbf16, #tpu.memory_space<vmem>>, vector<32x32xbf16>
      %cst_23 = arith.constant dense<0.000000e+00> : vector<2x32xf32>
      %42 = tpu.matmul %40, %41, %cst_23 {dimension_numbers = #tpu.dot_dimension_numbers<[1], [0], [0], [1], [0, 0, 1, 1], [], []>} : vector<2x32xbf16>, vector<32x32xbf16>, vector<2x32xf32> -> vector<2x32xf32>
      %c0_24 = arith.constant 0 : index
      %c0_25 = arith.constant 0 : index
      %43 = vector.load %arg6[%c0_24, %c0_25] : memref<1x32xf32, #tpu.memory_space<vmem>>, vector<1x32xf32>
      %44 = vector.broadcast %43 : vector<1x32xf32> to vector<2x32xf32>
      %45 = arith.addf %42, %44 : vector<2x32xf32>
      %c0_26 = arith.constant 0 : index
      %c0_27 = arith.constant 0 : index
      %46 = vector.load %arg9[%c0_26, %c0_27] : memref<2x32xf32, #tpu.memory_space<vmem>>, vector<2x32xf32>
      tpu.vector_store %arg9[%c0_26, %c0_27], %45 {strides = array<i32>} : memref<2x32xf32, #tpu.memory_space<vmem>>, vector<2x32xf32>,
    } else {
    }
    %c0 = arith.constant 0 : index
    %c0_1 = arith.constant 0 : index
    %c0_2 = arith.constant 0 : index
    %3 = vector.load %arg3[%c0, %c0_1, %c0_2] : memref<2x8x32xbf16, #tpu.memory_space<vmem>>, vector<2x8x32xbf16>
    %4 = vector.extract_strided_slice %3 {offsets = [0, 0, 0], sizes = [1, 8, 32], strides = [1, 1, 1]} : vector<2x8x32xbf16> to vector<1x8x32xbf16>
    %5 = vector.shape_cast %4 : vector<1x8x32xbf16> to vector<8x32xbf16>
    %c0_3 = arith.constant 0 : index
    %c0_4 = arith.constant 0 : index
    %6 = vector.load %arg5[%c0_3, %c0_4] : memref<32x32xbf16, #tpu.memory_space<vmem>>, vector<32x32xbf16>
    %cst = arith.constant dense<0.000000e+00> : vector<8x32xf32>
    %7 = tpu.matmul %5, %6, %cst {dimension_numbers = #tpu.dot_dimension_numbers<[1], [0], [0], [1], [0, 0, 1, 1], [], []>} : vector<8x32xbf16>, vector<32x32xbf16>, vector<8x32xf32> -> vector<8x32xf32>
    %8 = vector.shape_cast %7 : vector<8x32xf32> to vector<1x8x32xf32>
    %9 = vector.extract_strided_slice %3 {offsets = [1, 0, 0], sizes = [1, 8, 32], strides = [1, 1, 1]} : vector<2x8x32xbf16> to vector<1x8x32xbf16>
    %10 = vector.shape_cast %9 : vector<1x8x32xbf16> to vector<8x32xbf16>
    %c0_5 = arith.constant 0 : index
    %c0_6 = arith.constant 0 : index
    %11 = vector.load %arg5[%c0_5, %c0_6] : memref<32x32xbf16, #tpu.memory_space<vmem>>, vector<32x32xbf16>
    %cst_7 = arith.constant dense<0.000000e+00> : vector<8x32xf32>
    %12 = tpu.matmul %10, %11, %cst_7 {dimension_numbers = #tpu.dot_dimension_numbers<[1], [0], [0], [1], [0, 0, 1, 1], [], []>} : vector<8x32xbf16>, vector<32x32xbf16>, vector<8x32xf32> -> vector<8x32xf32>
    %13 = vector.shape_cast %12 : vector<8x32xf32> to vector<1x8x32xf32>
    %14 = tpu.concatenate %8, %13 in 0 : vector<1x8x32xf32>, vector<1x8x32xf32> -> vector<2x8x32xf32>
    %c0_8 = arith.constant 0 : index
    %c0_9 = arith.constant 0 : index
    %15 = vector.load %arg9[%c0_8, %c0_9] : memref<2x32xf32, #tpu.memory_space<vmem>>, vector<2x32xf32>
    %16 = vector.shape_cast %15 : vector<2x32xf32> to vector<2x1x32xf32>
    %17 = vector.broadcast %16 : vector<2x1x32xf32> to vector<2x8x32xf32>
    %18 = arith.addf %14, %17 : vector<2x8x32xf32>
    %19 = math.tanh %18 : vector<2x8x32xf32>
    %c0_10 = arith.constant 0 : index
    %c0_11 = arith.constant 0 : index
    %20 = vector.load %arg7[%c0_10, %c0_11] : memref<1x32xf32, #tpu.memory_space<vmem>>, vector<1x32xf32>
    %21 = vector.shape_cast %20 : vector<1x32xf32> to vector<1x1x32xf32>
    %22 = vector.broadcast %21 : vector<1x1x32xf32> to vector<2x8x32xf32>
    %23 = arith.mulf %19, %22 : vector<2x8x32xf32>
    %cst_12 = arith.constant dense<0.000000e+00> : vector<2x8xf32>
    %24 = vector.multi_reduction <add>, %23, %cst_12 [2] : vector<2x8x32xf32> to vector<2x8xf32>
    %c8_i32 = arith.constant 8 : i32
    %25 = arith.muli %arg1, %c8_i32 : i32
    %26 = tpu.iota {dimensions = array<i32: 1>} : vector<2x8xi32>
    %27 = vector.broadcast %25 : i32 to vector<2x8xi32>
    %28 = arith.addi %27, %26 : vector<2x8xi32>
    %c8_i32_13 = arith.constant 8 : i32
    %29 = vector.broadcast %c8_i32_13 : i32 to vector<2x8xi32>
    %30 = arith.cmpi slt, %28, %29 : vector<2x8xi32>
    %cst_14 = arith.constant 0xFF800000 : f32
    %31 = vector.broadcast %cst_14 : f32 to vector<2x8xf32>
    %32 = arith.select %30, %24, %31 : vector<2x8xi1>, vector<2x8xf32>
    %c0_15 = arith.constant 0 : index
    %33 = arith.index_cast %arg1 : i32 to index
    %c0_16 = arith.constant 0 : index
    %34 = vector.load %arg8[%c0_15, %33, %c0_16] : memref<2x1x8xf32, #tpu.memory_space<vmem>>, vector<2x1x8xf32>
    %35 = vector.shape_cast %34 : vector<2x1x8xf32> to vector<2x8xf32>
    %36 = vector.shape_cast %32 : vector<2x8xf32> to vector<2x1x8xf32>
    tpu.vector_store %arg8[%c0_15, %33, %c0_16], %36 {strides = array<i32>} : memref<2x1x8xf32, #tpu.memory_space<vmem>>, vector<2x1x8xf32>,
    %c0_i32_17 = arith.constant 0 : i32
    %37 = arith.cmpi eq, %arg1, %c0_i32_17 : i32
    %38 = arith.extui %37 : i1 to i32
    %c0_i32_18 = arith.constant 0 : i32
    %39 = arith.cmpi ne, %38, %c0_i32_18 : i32
    scf.if %39 {
      %c0_19 = arith.constant 0 : index
      %c0_20 = arith.constant 0 : index
      %c0_21 = arith.constant 0 : index
      %40 = vector.load %arg8[%c0_19, %c0_20, %c0_21] : memref<2x1x8xf32, #tpu.memory_space<vmem>>, vector<2x1x8xf32>
      %cst_22 = arith.constant dense<0xFF800000> : vector<2x1xf32>
      %41 = vector.multi_reduction <maximumf>, %40, %cst_22 [2] : vector<2x1x8xf32> to vector<2x1xf32>
      %42 = vector.shape_cast %41 : vector<2x1xf32> to vector<2x1x1xf32>
      %cst_23 = arith.constant dense<0xFF800000> : vector<2x1xf32>
      %43 = vector.multi_reduction <maximumf>, %42, %cst_23 [1] : vector<2x1x1xf32> to vector<2x1xf32>
      %44 = vector.shape_cast %43 : vector<2x1xf32> to vector<2x1x1xf32>
      %45 = vector.broadcast %44 : vector<2x1x1xf32> to vector<2x1x8xf32>
      %46 = arith.subf %40, %45 : vector<2x1x8xf32>
      %47 = math.exp %46 : vector<2x1x8xf32>
      %cst_24 = arith.constant dense<0.000000e+00> : vector<2x1xf32>
      %48 = vector.multi_reduction <add>, %47, %cst_24 [2] : vector<2x1x8xf32> to vector<2x1xf32>
      %49 = vector.shape_cast %48 : vector<2x1xf32> to vector<2x1x1xf32>
      %cst_25 = arith.constant dense<0.000000e+00> : vector<2x1xf32>
      %50 = vector.multi_reduction <add>, %49, %cst_25 [1] : vector<2x1x1xf32> to vector<2x1xf32>
      %51 = vector.shape_cast %50 : vector<2x1xf32> to vector<2x1x1xf32>
      %52 = vector.broadcast %51 : vector<2x1x1xf32> to vector<2x1x8xf32>
      %53 = arith.divf %47, %52 : vector<2x1x8xf32>
      %c0_26 = arith.constant 0 : index
      %c0_27 = arith.constant 0 : index
      %c0_28 = arith.constant 0 : index
      %54 = vector.load %arg8[%c0_26, %c0_27, %c0_28] : memref<2x1x8xf32, #tpu.memory_space<vmem>>, vector<2x1x8xf32>
      tpu.vector_store %arg8[%c0_26, %c0_27, %c0_28], %53 {strides = array<i32>} : memref<2x1x8xf32, #tpu.memory_space<vmem>>, vector<2x1x8xf32>,
    } else {
    }
    return
  }
  func.func @transform_0(%arg0: i32, %arg1: i32) -> (i32, i32) {
    %c0_i32 = arith.constant 0 : i32
    %c0_i32_0 = arith.constant 0 : i32
    return %arg0, %c0_i32 : i32, i32
  }
  func.func @transform_1(%arg0: i32, %arg1: i32) -> (i32, i32, i32) {
    %c0_i32 = arith.constant 0 : i32
    %c0_i32_0 = arith.constant 0 : i32
    return %arg0, %arg1, %c0_i32 : i32, i32, i32
  }
  func.func @transform_2(%arg0: i32, %arg1: i32) -> (i32, i32) {
    %c0_i32 = arith.constant 0 : i32
    %c0_i32_0 = arith.constant 0 : i32
    %c0_i32_1 = arith.constant 0 : i32
    return %c0_i32, %c0_i32_0 : i32, i32
  }
  func.func @transform_3(%arg0: i32, %arg1: i32) -> (i32, i32) {
    %c0_i32 = arith.constant 0 : i32
    %c0_i32_0 = arith.constant 0 : i32
    %c0_i32_1 = arith.constant 0 : i32
    return %c0_i32, %c0_i32_0 : i32, i32
  }
  func.func @transform_4(%arg0: i32, %arg1: i32) -> (i32, i32) {
    %c0_i32 = arith.constant 0 : i32
    %c0_i32_0 = arith.constant 0 : i32
    %c0_i32_1 = arith.constant 0 : i32
    return %c0_i32, %c0_i32_0 : i32, i32
  }
  func.func @transform_5(%arg0: i32, %arg1: i32) -> (i32, i32) {
    %c0_i32 = arith.constant 0 : i32
    %c0_i32_0 = arith.constant 0 : i32
    %c0_i32_1 = arith.constant 0 : i32
    return %c0_i32, %c0_i32_0 : i32, i32
  }
  func.func @transform_6(%arg0: i32, %arg1: i32) -> (i32, i32, i32) {
    %c0_i32 = arith.constant 0 : i32
    %c0_i32_0 = arith.constant 0 : i32
    %c0_i32_1 = arith.constant 0 : i32
    return %arg0, %c0_i32, %c0_i32_0 : i32, i32, i32
  }
}

</mosaic_0001>

<bundles_post_ra>
// kernel: tpu_custom_call.1
= control target key start
LH: loop header
LB: loop body
LE: loop exit
PB: predicated region body
PF: predicated region fallthrough
CT: control target
= control target key end

     0   :  { %11 = vsyncpa [#allocation4], 0  ;;  %s680_s0 = inlined_call_operand.hbm [shape: bf16[2,32], index: 0, kind: input, shape index: {}]   ;;  %s681_s1 = inlined_call_operand.hbm [shape: bf16[2,8,32], index: 1, kind: input, shape index: {}]   ;;  %s682_s2 = inlined_call_operand.hbm [shape: bf16[32,32], index: 2, kind: input, shape index: {}]   ;;  %s683_s3 = inlined_call_operand.hbm [shape: bf16[32,32], index: 3, kind: input, shape index: {}]   ;;  %s684_s4 = inlined_call_operand.vmem [shape: f32[1,32], index: 4, kind: input, shape index: {}]   ;;  %s685_s5 = inlined_call_operand.vmem [shape: f32[1,32], index: 5, kind: input, shape index: {}]   ;;  %s686_s6 = inlined_call_operand.hbm [shape: f32[2,1,8], index: 6, kind: output, shape index: {}]  }
   0x1   :  { %12 = vsyncpa [#allocation7], 0 }
   0x2   :  { %13 = vsyncpa [#allocation10], 0 }
   0x3   :  { %14 = vsyncpa [#allocation5], 0  ;;  %s587_s21 = smov [#allocation6]  }
   0x4   :  { %s30_s22 = sshll.u32 %s587_s21, 4  ;;  %s31_s22 = int_to_ptr.vmem [resolvable:$true] %s30_s22 }
   0x5   :  { %s487_s23 = scalar_lea.vmem %s31_s22, 128  ;;  %p492_p1 = scmp.lt.s32.totalorder %s31_s22, %s31_s22 }
   0x6   :  { %p488_p0 = scmp.ne.s32.totalorder %s31_s22, %s487_s23  ;;  %p493_p2 = scmp.lt.s32.totalorder %s487_s23, %s487_s23 }
   0x8   :  { %p494_p3 = por %p493_p2, %p492_p1 }
   0xa   :  { %p495_p4 = pnand %p494_p3, %p488_p0 }
   0xc   :  { %498 = shalt.err (!%p495_p4)
}
   0xd   :  { %s588_s24 = smov 64   ;;  %s589_s25 = smov 4  }
   0xe   :  { %36 = dma.hbm_to_vmem [thread:$0]  %s681_s1, 128, %s31_s22, [#allocation7], %s588_s24, %s588_s24, %s589_s25  }
   0xf   :  { %s590_s28 = smov [#allocation3]   ;;  %s591_s30 = smov [#allocation8]  }
  0x10   :  { %s21_s29 = sshll.u32 %s590_s28, 4  ;;  %s42_s7 = sshll.u32 %s591_s30, 4  ;;  %s22_s29 = int_to_ptr.vmem [resolvable:$true] %s21_s29  ;;  %s43_s7 = int_to_ptr.vmem [resolvable:$true] %s42_s7 }
  0x11   :  { %s507_s8 = scalar_lea.vmem %s22_s29, 16  ;;  %s511_s9 = scalar_lea.vmem %s22_s29, 32 }
  0x12   :  { %p508_p5 = scmp.ne.s32.totalorder %s22_s29, %s507_s8  ;;  %p512_p6 = scmp.lt.s32.totalorder %s22_s29, %s22_s29 }
  0x13   :  { %p513_p7 = scmp.lt.s32.totalorder %s511_s9, %s507_s8 }
  0x15   :  { %p514_p8 = por %p513_p7, %p512_p6 }
  0x17   :  { %p515_p9 = pnand %p514_p8, %p508_p5 }
  0x19   :  { %518 = shalt.err (!%p515_p9)
}
  0x1a   :  { %24 = dma.hbm_to_vmem [thread:$0]  %s680_s0, 16, %s22_s29, [#allocation4]  }
  0x1b   :  { %s527_s12 = scalar_lea.vmem %s43_s7, 256  ;;  %p532_p11 = scmp.lt.s32.totalorder %s43_s7, %s43_s7 }
  0x1c   :  { %p528_p10 = scmp.ne.s32.totalorder %s43_s7, %s527_s12  ;;  %p533_p12 = scmp.lt.s32.totalorder %s527_s12, %s527_s12 }
  0x1e   :  { %p534_p13 = por %p533_p12, %p532_p11 }
  0x20   :  { %p535_p0 = pnand %p534_p13, %p528_p10 }
  0x22   :  { %538 = shalt.err (!%p535_p0)
}
  0x23   :  { %48 = dma.hbm_to_vmem [thread:$0]  %s682_s2, 256, %s43_s7, [#allocation7], %s588_s24, %s588_s24, %s589_s25  }
  0x24   :  { %s592_s14 = smov [#allocation9]  }
  0x25   :  { %s54_s15 = sshll.u32 %s592_s14, 4  ;;  %s55_s15 = int_to_ptr.vmem [resolvable:$true] %s54_s15 }
  0x26   :  { %s547_s16 = scalar_lea.vmem %s55_s15, 256  ;;  %p552_p2 = scmp.lt.s32.totalorder %s55_s15, %s55_s15 }
  0x27   :  { %p548_p1 = scmp.ne.s32.totalorder %s55_s15, %s547_s16  ;;  %p553_p3 = scmp.lt.s32.totalorder %s547_s16, %s547_s16 }
  0x29   :  { %p554_p4 = por %p553_p3, %p552_p2 }
  0x2b   :  { %p555_p5 = pnand %p554_p4, %p548_p1 }
  0x2d   :  { %558 = shalt.err (!%p555_p5)
}
  0x2e   :  { %60 = dma.hbm_to_vmem [thread:$0]  %s683_s3, 256, %s55_s15, [#allocation10], %s588_s24, %s588_s24, %s589_s25  }
  0x2f   :  { %579 = dma.done.wait [#allocation4], 16  }
  0x30   :  { %580 = vsyncadd [#allocation4], 4294967280 }
  0x31   :  { %581 = dma.done.wait [#allocation7], 384  }
  0x32   :  { %582 = vsyncadd [#allocation7], 4294966912 }
  0x33   :  { %583 = dma.done.wait [#allocation10], 256  }
  0x34   :  { %584 = vsyncadd [#allocation10], 4294967040  ;;  %v593_v0 = vmov 0.0   ;;  %vm594_vm0 = vmmov 0   ;;  %v463_v1 = vld [vmem:[#allocation8 + $0x8] sm:$0xff]   ;;  %v464_v2 = vld [vmem:[#allocation8] sm:$0xff]   ;;  %v270_v8 = vlaneseq }
  0x35   :  { %427 = vmatprep.subr.bf16.mxu0 %v593_v0  ;;  %431 = vmatprep.mubr.msk.bf16.mxu0 %vm594_vm0, %v593_v0  ;;  %v465_v3 = vld [vmem:[#allocation9 + $0x8] sm:$0xff]   ;;  %v466_v4 = vld [vmem:[#allocation9] sm:$0xff]   ;;  %vm106_vm1 = vcmask 261120   ;;  %v595_v13 = vmov 1966171168   ;;  %vm150_vm2 = vcmask 254976  }
  0x36   :  { %435 = vmatprep.subr.bf16.mxu1 %v593_v0  ;;  %439 = vmatprep.mubr.msk.bf16.mxu1 %vm594_vm0, %v593_v0  ;;  %v82_v5 = vld [vmem:[#allocation3] sm:$0x1]  ;;  %v152_v6 = vld [vmem:[#allocation6] sm:$0xf]  ;;  %v153_v7 = vld [vmem:[#allocation6 + $0x4] sm:$0xf]  ;;  %v268_v14 = vunpack.c.l.s4 %v595_v13 }
  0x37   :  { %428 = vmatpush3.bf16.msra.mxu0 %v463_v1  ;;  %436 = vmatpush3.bf16.msra.mxu1 %v465_v3  ;;  %v271_v9 = vshrl.u32 %v270_v8, 7  ;;  %v312_v10 = vand.u32 127, %v270_v8  ;;  %v408_v12 = vld [vmem:[%s684_s4] ss:$0 sm:$0xff]  ;;  %vm326_vm3 = vcmask 1041409   ;;  %vm355_vm5 = vcmask 57344  }
  0x38   :  { %429 = vmatprep.subr.bf16.mxu0 %v593_v0  ;;  %437 = vmatprep.subr.bf16.mxu1 %v593_v0  ;;  %v269_v19 = vunpack.c.0.s8 %v268_v14  ;;  %v417_v39 = vld [vmem:[%s685_s5] ss:$0 sm:$0xff]  ;;  %s596_s5 = smov [#allocation11]  }
  0x39   :  { %v320_v11 = vsub.s32 %v312_v10, %v271_v9  ;;  %v283_v26 = vsub.s32 0, %v271_v9  ;;  %vm315_vm4 = vcmp.lt.s32.totalorder %v312_v10, 8  ;;  %s394_s19 = sshll.u32 %s596_s5, 4  ;;  %s395_s19 = int_to_ptr.vmem [resolvable:$true] %s394_s19 }
  0x3a   :  { %v272_v23 = vsub.s32 %v269_v19, %v271_v9  ;;  %s559_s20 = scalar_lea.vmem %s395_s19, 32  ;;  %p564_p7 = scmp.lt.s32.totalorder %s395_s19, %s395_s19 }
  0x3b   :  { %430 = vmatpush3.bf16.msra.mxu0 %v464_v2  ;;  %438 = vmatpush3.bf16.msra.mxu1 %v466_v4  ;;  %p560_p6 = scmp.ne.s32.totalorder %s395_s19, %s559_s20  ;;  %p565_p8 = scmp.lt.s32.totalorder %s559_s20, %s559_s20 }
  0x3c   :  { %443 = vmatprep.subr.bf16.mxu0 %v593_v0 }
  0x3d   :  { %p566_p9 = por %p565_p8, %p564_p7 }
  0x3e   :  { %432 = vmatmul.mubr.msk.bf16.vlgmr.msra.gmra.mxu0 %vm106_vm1, %v82_v5  ;;  %440 = vmatmul.mubr.msk.bf16.vlgmr.msra.gmra.mxu1 %vm106_vm1, %v152_v6 }
  0x3f   :  { %444 = vmatpush3.bf16.msra.mxu0 %v465_v3  ;;  %447 = vmatprep.mubr.msk.bf16.mxu0 %vm594_vm0, %v593_v0  ;;  %p567_p10 = pnand %p566_p9, %p560_p6 }
  0x40   :  { %445 = vmatprep.subr.bf16.mxu0 %v593_v0 }
  0x43   :  { %446 = vmatpush3.bf16.msra.mxu0 %v466_v4 }
  0x46   :  { %448 = vmatmul.mubr.msk.bf16.vlgmr.msra.gmra.mxu0 %vm106_vm1, %v153_v7 }
  0xfe   :  { %v144_v15 = vpop.f32.mrf.mxu0  ;;  %v208_v18 = vpop.f32.mrf.mxu1 }
  0xff   :  { %v145_v16 = vadd.f32 %v408_v12, %v144_v15 }
 0x100   :  { %v433_v17 = vpop.f32.mrf.mxu0  ;;  %v441_v21 = vpop.f32.mrf.mxu1 }
 0x101   :  { %151 = vst.msk [vmem:[#allocation2] sm:$0x3] %vm150_vm2, %v145_v16 }
 0x102   :  { %v147_v20 = vpop.f32.mrf.mxu0  ;;  %v211_v24 = vpop.f32.mrf.mxu1 }
 0x104   :  { %v434_v22 = vpop.f32.mrf.mxu0  ;;  %v442_v27 = vpop.f32.mrf.mxu1 }
 0x106   :  { %v251_v25 = vpop.f32.mrf.mxu0 }
 0x108   :  { %v416_v28 = vld.sshfl [vmem:[#allocation2] sm:$0x11 pattern:$0x75316420]  ;;  %v449_v29 = vpop.f32.mrf.mxu0 }
 0x109   :  { %v273_v30 = vrot.slane %v416_v28, %v272_v23  ;;  %v266_v31 = vcombine.high %v416_v28, %v416_v28 }
 0x10a   :  { %v254_v32 = vpop.f32.mrf.mxu0 }
 0x10b   :  { %v284_v33 = vrot.slane %v273_v30, %v283_v26  ;;  %v280_v34 = vrot.slane %v266_v31, %v272_v23 }
 0x10c   :  { %v450_v35 = vpop.f32.mrf.mxu0 }
 0x10d   :  { %v291_v36 = vadd.f32 %v284_v33, %v208_v18  ;;  %v288_v37 = vrot.slane %v280_v34, %v283_v26 }
 0x10f   :  { %467 = vtanh.f32 %v291_v36  ;;  %v292_v38 = vadd.f32 %v288_v37, %v251_v25 }
 0x111   :  { %469 = vtanh.f32 %v292_v38 }
 0x11c   :  { %v468_v40 = vpop.eup %467 }
 0x11d   :  { %v302_v41 = vmul.f32 %v468_v40, %v417_v39 }
 0x11e   :  { %v470_v42 = vpop.eup %469 }
 0x11f   :  { %v304_v43 = vsel %vm106_vm1, %v302_v41, 0.0  ;;  %v303_v44 = vmul.f32 %v470_v42, %v417_v39 }
 0x120   :  { %305 = vadd.xlane.f32.xlu0 %v304_v43 }
 0x121   :  { %v307_v45 = vsel %vm106_vm1, %v303_v44, 0.0 }
 0x124   :  { %308 = vadd.xlane.f32.xlu0 %v307_v45 }
 0x1a9   :  { %v306_v46 = vpop.xlane.xlu0 %305 }
 0x1aa   :  { %v321_v48 = vrot.slane %v306_v46, %v320_v11 }
 0x1ad   :  { %v309_v47 = vpop.xlane.xlu0 %308 }
 0x1ae   :  { %v325_v49 = vrot.slane %v309_v47, %v320_v11 }
 0x1b0   :  { %v327_v50 = vsel %vm326_vm3, %v325_v49, %v321_v48 }
 0x1b1   :  { %v329_v51 = vsel %vm315_vm4, %v327_v50, -inf }
 0x1b2   :  { %v337_v52 = vrot.slane %v329_v51, %v272_v23 }
 0x1b4   :  { %v338_v53 = vcombine.high %v337_v52, %v337_v52  ;;  %v345_v54 = vrot.slane %v337_v52, %v272_v23 }
 0x1b6   :  { %v352_v55 = vrot.slane %v338_v53, %v272_v23  ;;  %356 = vst.msk [vmem:[#allocation11] sm:$0x1] %vm355_vm5, %v345_v54 }
 0x1b8   :  { %357 = vst.msk [vmem:[#allocation11 + $0x1] sm:$0x1] %vm355_vm5, %v352_v55 }
 0x1bd   :  { %v361_v56 = vld [vmem:[#allocation11] sm:$0x1] }
 0x1be   :  { %v363_v57 = vsel %vm355_vm5, %v361_v56, -inf }
 0x1bf   :  { %364 = vmax.xlane.f32.xlu1 %v363_v57  ;;  %v362_v58 = vld [vmem:[#allocation11 + $0x1] sm:$0x1] }
 0x1c0   :  { %v366_v59 = vsel %vm355_vm5, %v362_v58, -inf }
 0x1c3   :  { %367 = vmax.xlane.f32.xlu1 %v366_v59 }
 0x248   :  { %v365_v60 = vpop.xlane.xlu1 %364 }
 0x249   :  { %v369_v61 = vsub.f32 %v361_v56, %v365_v60 }
 0x24b   :  { %v371_v62 = vmul.f32 1.442695, %v369_v61 }
 0x24c   :  { %v368_v63 = vpop.xlane.xlu1 %367 }
 0x24d   :  { %471 = vpow2.f32 %v371_v62  ;;  %v370_v0 = vsub.f32 %v362_v58, %v368_v63 }
 0x24f   :  { %v373_v1 = vmul.f32 1.442695, %v370_v0 }
 0x251   :  { %473 = vpow2.f32 %v373_v1 }
 0x25a   :  { %v472_v2 = vpop.eup %471 }
 0x25b   :  { %v375_v3 = vsel %vm355_vm5, %v472_v2, 0.0 }
 0x25c   :  { %376 = vadd.xlane.f32.xlu0 %v375_v3 }
 0x25e   :  { %v474_v4 = vpop.eup %473 }
 0x25f   :  { %v378_v5 = vsel %vm355_vm5, %v474_v4, 0.0 }
 0x260   :  { %379 = vadd.xlane.f32.xlu1 %v378_v5 }
 0x2e5   :  { %v377_v6 = vpop.xlane.xlu0 %376 }
 0x2e6   :  { %475 = vrcp.f32 %v377_v6 }
 0x2e9   :  { %v380_v7 = vpop.xlane.xlu1 %379 }
 0x2ea   :  { %477 = vrcp.f32 %v380_v7 }
 0x2f3   :  { %v476_v8 = vpop.eup %475 }
 0x2f4   :  { %v384_v9 = vmul.f32 %v476_v8, %v472_v2 }
 0x2f6   :  { %387 = vst.msk [vmem:[#allocation11] sm:$0x1] %vm355_vm5, %v384_v9 }
 0x2f7   :  { %v478_v10 = vpop.eup %477 }
 0x2f8   :  { %v386_v11 = vmul.f32 %v478_v10, %v474_v4 }
 0x2fa   :  { %388 = vst.msk [vmem:[#allocation11 + $0x1] sm:$0x1] %vm355_vm5, %v386_v11 }
 0x2fb   :  { %570 = shalt.err (!%p567_p10)
}
 0x2fc   :  { %s597_s21 = smov 16   ;;  %s598_s22 = smov 1  }
 0x2fd   :  { %400 = dma.vmem_to_hbm [thread:$0]  %s395_s19, 32, %s686_s6, [#allocation5], %s597_s21, %s597_s21, %s598_s22  }
 0x2fe   :  { %585 = dma.done.wait [#allocation5], 32  }
 0x2ff   :  { %586 = vsyncadd [#allocation5], 4294967264 }
 0x300   :  { %404 = vsyncpa [#allocation4], 1 }
 0x301   :  { %405 = vsyncpa [#allocation7], 1 }
 0x302   :  { %406 = vsyncpa [#allocation10], 1 }
 0x303   :  { %407 = vsyncpa [#allocation5], 1 }

</bundles_post_ra>
